<compile_context>
chip_gen: v7x
topology: tpu7x:2x2x1
jax: 0.10.0
libtpu: 0.0.40
codegen_flags: <defaults>
</compile_context>

<pallas_src>
import functools

import numpy as np

import jax
import jax.numpy as jnp
from jax import lax
from jax.experimental import pallas as pl
from jax.experimental.pallas import tpu as pltpu


# murmur3 fmix32 constants, expressed as wrapped int32 values.
_FMIX_C1 = np.int32(-2048144789)   # 0x85EBCA6B
_FMIX_C2 = np.int32(-1028477387)   # 0xC2B2AE35


def _srl(x, k):
    """Logical right shift for int32 (mask off sign-extended high bits)."""
    return jnp.right_shift(x, k) & np.int32((1 << (32 - k)) - 1)


def _uniform_bits(block_rows, n_cols, row_offset, seed):
    """Per-element pseudo-random int32 in [0, 2**31), from the global element
    index via the murmur3 finalizer.  Pure int32 jnp ops -> lowers on Mosaic
    and in interpret mode; mask is independent of the tiling."""
    shape = (block_rows, n_cols)
    row = lax.broadcasted_iota(jnp.int32, shape, 0) + row_offset
    col = lax.broadcasted_iota(jnp.int32, shape, 1)
    h = row * np.int32(n_cols) + col
    h = h ^ seed
    h = h ^ _srl(h, 16)
    h = h * _FMIX_C1
    h = h ^ _srl(h, 13)
    h = h * _FMIX_C2
    h = h ^ _srl(h, 16)
    return h & np.int32(0x7FFFFFFF)


def _stats_kernel(x_ref, w_ref, g_ref, b_ref, scale_ref, shift_ref,
                  sum_acc, ssq_acc, *, n_rows, eps):
    """Pass 1: accumulate per-channel sum / sum-of-squares of y = x @ W over
    the row grid; on the last step emit scale = gamma*rsqrt(var+eps) and
    shift = beta - mean*scale.  (The linear bias cancels under batch-stat BN,
    so it is never added; zero-padded rows then contribute nothing.)"""
    @pl.when(pl.program_id(0) == 0)
    def _init():
        sum_acc[...] = jnp.zeros_like(sum_acc)
        ssq_acc[...] = jnp.zeros_like(ssq_acc)

    y = jnp.dot(x_ref[...], w_ref[...], preferred_element_type=jnp.float32)
    sum_acc[...] += jnp.sum(y, axis=0, keepdims=True)
    ssq_acc[...] += jnp.sum(y * y, axis=0, keepdims=True)

    @pl.when(pl.program_id(0) == pl.num_programs(0) - 1)
    def _finalize():
        inv_n = 1.0 / n_rows
        mean = sum_acc[...] * inv_n
        # f32 accumulators; clamp tiny negative cancellation residue.
        var = jnp.maximum(ssq_acc[...] * inv_n - mean * mean, 0.0)
        scale = g_ref[...] * lax.rsqrt(var + eps)
        scale_ref[...] = scale
        shift_ref[...] = b_ref[...] - mean * scale


def _apply_kernel(seed_ref, x_ref, w_ref, scale_ref, shift_ref, o_ref, *,
                  block_rows, n_cols, keep_threshold, inv_keep, apply_dropout):
    """Pass 2: recompute y = x @ W per tile, fused normalize + SiLU + dropout."""
    y = jnp.dot(x_ref[...], w_ref[...], preferred_element_type=jnp.float32)
    y = y * scale_ref[...] + shift_ref[...]
    # SiLU: sigmoid(y) = 0.5*(tanh(y/2)+1) -> one EUP transcendental, no divide.
    y = y * (0.5 * jnp.tanh(0.5 * y) + 0.5)

    if apply_dropout:
        row0 = pl.program_id(0) * block_rows
        u = _uniform_bits(block_rows, n_cols, row0, seed_ref[0])
        y = jnp.where(u < np.int32(keep_threshold), y * inv_keep, 0.0)

    o_ref[...] = y.astype(o_ref.dtype)


def _default_block_rows(m, target=512):
    """Largest row tile <= target (multiple of 8), avoiding padding if possible."""
    if m <= target:
        return max(8, ((m + 7) // 8) * 8)
    for tm in (512, 448, 384, 320, 256, 192, 128, 64, 32, 16, 8):
        if m % tm == 0:
            return tm
    return target


def _vmem_limit_bytes(tm, cin, cout):
    # Resident W + double-buffered x/out tiles + the small (1, Cout) vectors.
    est = 4 * (cin * cout + 2 * tm * cin + 2 * tm * cout + 8 * cout)
    # Never below the default scoped limit; stay under v7x's 64 MiB physical.
    return int(min(48 * 2 ** 20, max(32 * 2 ** 20, 2 * est)))


def my_linear_bn2d_forward(x, weight, bias, gamma, beta, *,
                           eps=1e-5, dropout_rate=0.15, training=True, seed=0,
                           block_rows=None):
    """Forward pass of MyLinearBN2D.

    x:      (B, S, in_channels)
    weight: (out_channels, in_channels)   -- nn.Linear layout
    bias:   (out_channels,)  -- accepted but unused: it cancels exactly under
            training-mode (batch-statistics) BatchNorm.
    gamma, beta: (out_channels,)          -- BatchNorm1d affine parameters
    `training` only gates dropout; BN always uses batch statistics.
    """
    # TODO(synk): eval-mode BN (running_mean/running_var, where the linear bias
    # would matter) and the running-stat EMA updates are training-side state
    # not implemented here; BN uses batch statistics (PyTorch training forward).
    del bias
    B, S, Cin = x.shape
    Cout, Cin_w = weight.shape
    assert Cin_w == Cin, f"in_channels mismatch: {Cin_w} vs {Cin}"

    M = B * S
    TM = _default_block_rows(M) if block_rows is None else int(block_rows)
    M_pad = pl.cdiv(M, TM) * TM
    grid = (M_pad // TM,)

    x2d = x.reshape(M, Cin)
    if M_pad != M:
        # Zero rows contribute nothing to the (bias-free) channel sums, so the
        # batch statistics stay exact; the extra output rows are sliced off.
        x2d = jnp.pad(x2d, ((0, M_pad - M), (0, 0)))

    # TODO(synk): in production store the weight pre-transposed as (Cin, Cout)
    # so this transpose is not redone every forward call (here it is done once
    # and shared by both passes).
    w = weight.T
    g2d = gamma.reshape(1, Cout).astype(jnp.float32)
    b2d = beta.reshape(1, Cout).astype(jnp.float32)

    vmem_limit = _vmem_limit_bytes(TM, Cin, Cout)

    # ---------------- Pass 1: per-channel batch statistics -----------------
    stats_kernel = functools.partial(_stats_kernel, n_rows=float(M), eps=float(eps))
    scale, shift = pl.pallas_call(
        stats_kernel,
        grid=grid,
        in_specs=[
            pl.BlockSpec((TM, Cin), lambda i: (i, 0)),      # x tile
            pl.BlockSpec((Cin, Cout), lambda i: (0, 0)),    # W^T (resident)
            pl.BlockSpec((1, Cout), lambda i: (0, 0)),      # gamma
            pl.BlockSpec((1, Cout), lambda i: (0, 0)),      # beta
        ],
        out_specs=(
            pl.BlockSpec((1, Cout), lambda i: (0, 0)),      # scale
            pl.BlockSpec((1, Cout), lambda i: (0, 0)),      # shift
        ),
        out_shape=(
            jax.ShapeDtypeStruct((1, Cout), jnp.float32),
            jax.ShapeDtypeStruct((1, Cout), jnp.float32),
        ),
        scratch_shapes=[pltpu.VMEM((1, Cout), jnp.float32),
                        pltpu.VMEM((1, Cout), jnp.float32)],
        compiler_params=pltpu.CompilerParams(
            dimension_semantics=("arbitrary",),
            vmem_limit_bytes=vmem_limit),
    )(x2d, w, g2d, b2d)

    # ---------------- Pass 2: normalize + SiLU + dropout --------------------
    apply_dropout = bool(training) and float(dropout_rate) > 0.0
    keep = 1.0 - float(dropout_rate)
    apply_kernel = functools.partial(
        _apply_kernel,
        block_rows=TM,
        n_cols=Cout,
        keep_threshold=int(keep * (2 ** 31)) if apply_dropout else 0,
        inv_keep=(1.0 / keep) if apply_dropout else 1.0,
        apply_dropout=apply_dropout,
    )
    seed_arr = jnp.asarray([seed], dtype=jnp.int32)

    grid_spec = pltpu.PrefetchScalarGridSpec(
        num_scalar_prefetch=1,          # seed -> SMEM, first kernel argument
        grid=grid,
        in_specs=[
            pl.BlockSpec((TM, Cin), lambda i, seed_ref: (i, 0)),    # x tile
            pl.BlockSpec((Cin, Cout), lambda i, seed_ref: (0, 0)),  # W^T
            pl.BlockSpec((1, Cout), lambda i, seed_ref: (0, 0)),    # scale
            pl.BlockSpec((1, Cout), lambda i, seed_ref: (0, 0)),    # shift
        ],
        out_specs=pl.BlockSpec((TM, Cout), lambda i, seed_ref: (i, 0)),
    )
    out2d = pl.pallas_call(
        apply_kernel,
        grid_spec=grid_spec,
        out_shape=jax.ShapeDtypeStruct((M_pad, Cout), x.dtype),
        compiler_params=pltpu.CompilerParams(
            dimension_semantics=("parallel",),
            vmem_limit_bytes=vmem_limit),
    )(seed_arr, x2d, w, scale, shift)

    if M_pad != M:
        out2d = out2d[:M]
    return out2d.reshape(B, S, Cout)


def _reference_no_dropout(x, weight, bias, gamma, beta, eps=1e-5):
    """Pure-JAX reference of Linear -> BN(batch stats) -> SiLU (dropout off)."""
    y = jnp.einsum("bsi,oi->bso", x, weight,
                   precision=lax.Precision.HIGHEST) + bias
    mean = jnp.mean(y, axis=(0, 1), keepdims=True)
    var = jnp.mean(jnp.square(y - mean), axis=(0, 1), keepdims=True)
    y = (y - mean) / jnp.sqrt(var + eps)
    y = y * gamma + beta
    return y * jax.nn.sigmoid(y)


if __name__ == "__main__":
    key = jax.random.PRNGKey(0)
    kx, kw, kb, kg, kbt = jax.random.split(key, 5)

    # Small shapes implied by the forward: x is (batch, seq, in_channels).
    B, S, Cin, Cout = 2, 8, 32, 128
    x = jax.random.normal(kx, (B, S, Cin), dtype=jnp.float32)
    weight = 0.1 * jax.random.normal(kw, (Cout, Cin), dtype=jnp.float32)
    bias = 0.1 * jax.random.normal(kb, (Cout,), dtype=jnp.float32)
    gamma = 1.0 + 0.1 * jax.random.normal(kg, (Cout,), dtype=jnp.float32)
    beta = 0.1 * jax.random.normal(kbt, (Cout,), dtype=jnp.float32)

    y_ref = _reference_no_dropout(x, weight, bias, gamma, beta)

    # 1) Deterministic path (dropout off), default single-tile grid.
    y0 = jax.block_until_ready(
        my_linear_bn2d_forward(x, weight, bias, gamma, beta,
                               dropout_rate=0.0, training=False))
    assert y0.shape == (B, S, Cout)
    assert y0.dtype == x.dtype
    err0 = float(jnp.max(jnp.abs(y0 - y_ref)))
    assert err0 < 2e-2, err0

    # 2) Multi-tile grid (block_rows=8 -> 2 grid steps, exercises the
    #    cross-tile stats accumulator) and a padded variant (block_rows=24).
    for br in (8, 24):
        yb = jax.block_until_ready(
            my_linear_bn2d_forward(x, weight, bias, gamma, beta,
                                   dropout_rate=0.0, training=False,
                                   block_rows=br))
        errb = float(jnp.max(jnp.abs(yb - y_ref)))
        assert yb.shape == (B, S, Cout)
        assert errb < 2e-2, (br, errb)

    # 3) Training-mode forward: batch-stat BN + SiLU + seeded dropout (p=0.15).
    yd = jax.block_until_ready(
        my_linear_bn2d_forward(x, weight, bias, gamma, beta,
                               dropout_rate=0.15, training=True, seed=123))
    yd2 = jax.block_until_ready(
        my_linear_bn2d_forward(x, weight, bias, gamma, beta,
                               dropout_rate=0.15, training=True, seed=123))
    assert yd.shape == (B, S, Cout)
    assert yd.dtype == x.dtype
    assert bool(jnp.all(jnp.isfinite(yd)))
    drop_frac = float(jnp.mean(yd == 0.0))
    assert 0.02 < drop_frac < 0.40, drop_frac          # expected ~0.15
    assert bool(jnp.all(yd == yd2))                    # same seed -> same mask

    print("KERNEL_OK")
</pallas_src>

<mosaic_0001>
module attributes {stable_mosaic.version = 11 : i64} {
  func.func @_stats_kernel(%arg0: i32, %arg1: memref<16x32xf32, #tpu.memory_space<vmem>>, %arg2: memref<32x128xf32, #tpu.memory_space<vmem>>, %arg3: memref<1x128xf32, #tpu.memory_space<vmem>>, %arg4: memref<1x128xf32, #tpu.memory_space<vmem>>, %arg5: memref<1x128xf32, #tpu.memory_space<vmem>>, %arg6: memref<1x128xf32, #tpu.memory_space<vmem>>, %arg7: memref<1x128xf32, #tpu.memory_space<vmem>>, %arg8: memref<1x128xf32, #tpu.memory_space<vmem>>) attributes {dimension_semantics = [#tpu.dimension_semantics<arbitrary>], iteration_bounds = array<i64: 1>, scalar_prefetch = 0 : i64, scratch_operands = 2 : i64, tpu.core_type = #tpu.core_type<tc>, window_params = [{transform_indices = @transform_0, window_bounds = array<i64: 16, 32>}, {pipeline_mode = #tpu.pipeline_mode<synchronous>, transform_indices = @transform_1, window_bounds = array<i64: 32, 128>}, {pipeline_mode = #tpu.pipeline_mode<synchronous>, transform_indices = @transform_2, window_bounds = array<i64: 1, 128>}, {pipeline_mode = #tpu.pipeline_mode<synchronous>, transform_indices = @transform_3, window_bounds = array<i64: 1, 128>}, {pipeline_mode = #tpu.pipeline_mode<synchronous>, transform_indices = @transform_4, window_bounds = array<i64: 1, 128>}, {pipeline_mode = #tpu.pipeline_mode<synchronous>, transform_indices = @transform_5, window_bounds = array<i64: 1, 128>}]} {
    %c0_i32 = arith.constant 0 : i32
    %0 = arith.cmpi eq, %arg0, %c0_i32 : i32
    %1 = arith.extui %0 : i1 to i32
    %c0_i32_0 = arith.constant 0 : i32
    %2 = arith.cmpi ne, %1, %c0_i32_0 : i32
    scf.if %2 {
      %cst_16 = arith.constant 0.000000e+00 : f32
      %20 = vector.broadcast %cst_16 : f32 to vector<1x128xf32>
      %c0_17 = arith.constant 0 : index
      %c0_18 = arith.constant 0 : index
      %21 = vector.load %arg7[%c0_17, %c0_18] : memref<1x128xf32, #tpu.memory_space<vmem>>, vector<1x128xf32>
      tpu.vector_store %arg7[%c0_17, %c0_18], %20 {strides = array<i32>} : memref<1x128xf32, #tpu.memory_space<vmem>>, vector<1x128xf32>,
      %cst_19 = arith.constant 0.000000e+00 : f32
      %22 = vector.broadcast %cst_19 : f32 to vector<1x128xf32>
      %c0_20 = arith.constant 0 : index
      %c0_21 = arith.constant 0 : index
      %23 = vector.load %arg8[%c0_20, %c0_21] : memref<1x128xf32, #tpu.memory_space<vmem>>, vector<1x128xf32>
      tpu.vector_store %arg8[%c0_20, %c0_21], %22 {strides = array<i32>} : memref<1x128xf32, #tpu.memory_space<vmem>>, vector<1x128xf32>,
    } else {
    }
    %c0 = arith.constant 0 : index
    %c0_1 = arith.constant 0 : index
    %3 = vector.load %arg1[%c0, %c0_1] : memref<16x32xf32, #tpu.memory_space<vmem>>, vector<16x32xf32>
    %c0_2 = arith.constant 0 : index
    %c0_3 = arith.constant 0 : index
    %4 = vector.load %arg2[%c0_2, %c0_3] : memref<32x128xf32, #tpu.memory_space<vmem>>, vector<32x128xf32>
    %cst = arith.constant dense<0.000000e+00> : vector<16x128xf32>
    %5 = tpu.matmul %3, %4, %cst {dimension_numbers = #tpu.dot_dimension_numbers<[1], [0], [0], [1], [0, 0, 1, 1], [], []>} : vector<16x32xf32>, vector<32x128xf32>, vector<16x128xf32> -> vector<16x128xf32>
    %c0_4 = arith.constant 0 : index
    %c0_5 = arith.constant 0 : index
    %6 = vector.load %arg7[%c0_4, %c0_5] : memref<1x128xf32, #tpu.memory_space<vmem>>, vector<1x128xf32>
    %cst_6 = arith.constant dense<0.000000e+00> : vector<128xf32>
    %7 = vector.multi_reduction <add>, %5, %cst_6 [0] : vector<16x128xf32> to vector<128xf32>
    %8 = vector.shape_cast %7 : vector<128xf32> to vector<1x128xf32>
    %9 = arith.addf %6, %8 : vector<1x128xf32>
    %c0_7 = arith.constant 0 : index
    %c0_8 = arith.constant 0 : index
    %10 = vector.load %arg7[%c0_7, %c0_8] : memref<1x128xf32, #tpu.memory_space<vmem>>, vector<1x128xf32>
    tpu.vector_store %arg7[%c0_7, %c0_8], %9 {strides = array<i32>} : memref<1x128xf32, #tpu.memory_space<vmem>>, vector<1x128xf32>,
    %c0_9 = arith.constant 0 : index
    %c0_10 = arith.constant 0 : index
    %11 = vector.load %arg8[%c0_9, %c0_10] : memref<1x128xf32, #tpu.memory_space<vmem>>, vector<1x128xf32>
    %12 = arith.mulf %5, %5 : vector<16x128xf32>
    %cst_11 = arith.constant dense<0.000000e+00> : vector<128xf32>
    %13 = vector.multi_reduction <add>, %12, %cst_11 [0] : vector<16x128xf32> to vector<128xf32>
    %14 = vector.shape_cast %13 : vector<128xf32> to vector<1x128xf32>
    %15 = arith.addf %11, %14 : vector<1x128xf32>
    %c0_12 = arith.constant 0 : index
    %c0_13 = arith.constant 0 : index
    %16 = vector.load %arg8[%c0_12, %c0_13] : memref<1x128xf32, #tpu.memory_space<vmem>>, vector<1x128xf32>
    tpu.vector_store %arg8[%c0_12, %c0_13], %15 {strides = array<i32>} : memref<1x128xf32, #tpu.memory_space<vmem>>, vector<1x128xf32>,
    %c0_i32_14 = arith.constant 0 : i32
    %17 = arith.cmpi eq, %arg0, %c0_i32_14 : i32
    %18 = arith.extui %17 : i1 to i32
    %c0_i32_15 = arith.constant 0 : i32
    %19 = arith.cmpi ne, %18, %c0_i32_15 : i32
    scf.if %19 {
      %c0_16 = arith.constant 0 : index
      %c0_17 = arith.constant 0 : index
      %20 = vector.load %arg7[%c0_16, %c0_17] : memref<1x128xf32, #tpu.memory_space<vmem>>, vector<1x128xf32>
      %cst_18 = arith.constant 6.250000e-02 : f32
      %21 = vector.broadcast %cst_18 : f32 to vector<1x128xf32>
      %22 = arith.mulf %20, %21 : vector<1x128xf32>
      %c0_19 = arith.constant 0 : index
      %c0_20 = arith.constant 0 : index
      %23 = vector.load %arg8[%c0_19, %c0_20] : memref<1x128xf32, #tpu.memory_space<vmem>>, vector<1x128xf32>
      %cst_21 = arith.constant 6.250000e-02 : f32
      %24 = vector.broadcast %cst_21 : f32 to vector<1x128xf32>
      %25 = arith.mulf %23, %24 : vector<1x128xf32>
      %26 = arith.mulf %22, %22 : vector<1x128xf32>
      %27 = arith.subf %25, %26 : vector<1x128xf32>
      %cst_22 = arith.constant 0.000000e+00 : f32
      %28 = vector.broadcast %cst_22 : f32 to vector<1x128xf32>
      %29 = arith.maximumf %27, %28 : vector<1x128xf32>
      %c0_23 = arith.constant 0 : index
      %c0_24 = arith.constant 0 : index
      %30 = vector.load %arg3[%c0_23, %c0_24] : memref<1x128xf32, #tpu.memory_space<vmem>>, vector<1x128xf32>
      %cst_25 = arith.constant 9.99999974E-6 : f32
      %31 = vector.broadcast %cst_25 : f32 to vector<1x128xf32>
      %32 = arith.addf %29, %31 : vector<1x128xf32>
      %33 = math.rsqrt %32 : vector<1x128xf32>
      %34 = arith.mulf %30, %33 : vector<1x128xf32>
      %c0_26 = arith.constant 0 : index
      %c0_27 = arith.constant 0 : index
      %35 = vector.load %arg5[%c0_26, %c0_27] : memref<1x128xf32, #tpu.memory_space<vmem>>, vector<1x128xf32>
      tpu.vector_store %arg5[%c0_26, %c0_27], %34 {strides = array<i32>} : memref<1x128xf32, #tpu.memory_space<vmem>>, vector<1x128xf32>,
      %c0_28 = arith.constant 0 : index
      %c0_29 = arith.constant 0 : index
      %36 = vector.load %arg4[%c0_28, %c0_29] : memref<1x128xf32, #tpu.memory_space<vmem>>, vector<1x128xf32>
      %37 = arith.mulf %22, %34 : vector<1x128xf32>
      %38 = arith.subf %36, %37 : vector<1x128xf32>
      %c0_30 = arith.constant 0 : index
      %c0_31 = arith.constant 0 : index
      %39 = vector.load %arg6[%c0_30, %c0_31] : memref<1x128xf32, #tpu.memory_space<vmem>>, vector<1x128xf32>
      tpu.vector_store %arg6[%c0_30, %c0_31], %38 {strides = array<i32>} : memref<1x128xf32, #tpu.memory_space<vmem>>, vector<1x128xf32>,
    } else {
    }
    return
  }
  func.func @transform_0(%arg0: i32) -> (i32, i32) {
    %c0_i32 = arith.constant 0 : i32
    %c0_i32_0 = arith.constant 0 : i32
    return %arg0, %c0_i32 : i32, i32
  }
  func.func @transform_1(%arg0: i32) -> (i32, i32) {
    %c0_i32 = arith.constant 0 : i32
    %c0_i32_0 = arith.constant 0 : i32
    %c0_i32_1 = arith.constant 0 : i32
    return %c0_i32, %c0_i32_0 : i32, i32
  }
  func.func @transform_2(%arg0: i32) -> (i32, i32) {
    %c0_i32 = arith.constant 0 : i32
    %c0_i32_0 = arith.constant 0 : i32
    %c0_i32_1 = arith.constant 0 : i32
    return %c0_i32, %c0_i32_0 : i32, i32
  }
  func.func @transform_3(%arg0: i32) -> (i32, i32) {
    %c0_i32 = arith.constant 0 : i32
    %c0_i32_0 = arith.constant 0 : i32
    %c0_i32_1 = arith.constant 0 : i32
    return %c0_i32, %c0_i32_0 : i32, i32
  }
  func.func @transform_4(%arg0: i32) -> (i32, i32) {
    %c0_i32 = arith.constant 0 : i32
    %c0_i32_0 = arith.constant 0 : i32
    %c0_i32_1 = arith.constant 0 : i32
    return %c0_i32, %c0_i32_0 : i32, i32
  }
  func.func @transform_5(%arg0: i32) -> (i32, i32) {
    %c0_i32 = arith.constant 0 : i32
    %c0_i32_0 = arith.constant 0 : i32
    %c0_i32_1 = arith.constant 0 : i32
    return %c0_i32, %c0_i32_0 : i32, i32
  }
}

</mosaic_0001>

<bundles_post_ra>
// kernel: tpu_custom_call.1
= control target key start
LH: loop header
LB: loop body
LE: loop exit
PB: predicated region body
PF: predicated region fallthrough
CT: control target
= control target key end

     0   :  { %11 = vsyncpa [#allocation5], 0  ;;  %s437_s0 = inlined_call_operand.hbm [shape: f32[16,32], index: 0, kind: input, shape index: {}]   ;;  %s438_s1 = inlined_call_operand.hbm [shape: f32[32,128], index: 1, kind: input, shape index: {}]   ;;  %s439_s2 = inlined_call_operand.vmem [shape: f32[1,128], index: 2, kind: input, shape index: {}]   ;;  %s440_s3 = inlined_call_operand.vmem [shape: f32[1,128], index: 3, kind: input, shape index: {}]   ;;  %s441_s4 = inlined_call_operand.hbm [shape: f32[1,128], index: 4, kind: output, shape index: {0}]   ;;  %s442_s5 = inlined_call_operand.hbm [shape: f32[1,128], index: 5, kind: output, shape index: {1}]  }
   0x1   :  { %12 = vsyncpa [#allocation8], 0 }
   0x2   :  { %13 = vsyncpa [#allocation6], 0 }
   0x3   :  { %14 = vsyncpa [#allocation11], 0  ;;  %s346_s18 = smov [#allocation4]   ;;  %s250_s22 = scalar_lea.hbm %s437_s0, 256 }
   0x4   :  { %s20_s19 = sshll.u32 %s346_s18, 4  ;;  %p251_p0 = scmp.ne.s32.totalorder %s437_s0, %s250_s22  ;;  %s21_s19 = int_to_ptr.vmem [resolvable:$true] %s20_s19 }
   0x5   :  { %p254_p1 = scmp.lt.u32.totalorder %s250_s22, %s437_s0 }
   0x7   :  { %p256_p2 = pnand %p254_p1, %p251_p0 }
   0x9   :  { %259 = shalt.err (!%p256_p2)
}
   0xa   :  { %s260_s27 = scalar_lea.vmem %s21_s19, 256  ;;  %p265_p4 = scmp.lt.s32.totalorder %s21_s19, %s21_s19 }
   0xb   :  { %p261_p3 = scmp.ne.s32.totalorder %s21_s19, %s260_s27  ;;  %p266_p5 = scmp.lt.s32.totalorder %s260_s27, %s260_s27 }
   0xd   :  { %p267_p6 = por %p266_p5, %p265_p4 }
   0xf   :  { %p268_p7 = pnand %p267_p6, %p261_p3 }
  0x11   :  { %271 = shalt.err (!%p268_p7)
}
  0x12   :  { %s347_s28 = smov 128   ;;  %s348_s29 = smov 8  }
  0x13   :  { %26 = dma.hbm_to_vmem [thread:$0]  %s437_s0, 256, %s21_s19, [#allocation5], %s347_s28, %s347_s28, %s348_s29  }
  0x14   :  { %s349_s7 = smov [#allocation7]   ;;  %s272_s11 = scalar_lea.hbm %s438_s1, 512 }
  0x15   :  { %s32_s8 = sshll.u32 %s349_s7, 4  ;;  %p273_p8 = scmp.ne.s32.totalorder %s438_s1, %s272_s11  ;;  %s33_s8 = int_to_ptr.vmem [resolvable:$true] %s32_s8 }
  0x16   :  { %p276_p9 = scmp.lt.u32.totalorder %s272_s11, %s438_s1 }
  0x18   :  { %p278_p10 = pnand %p276_p9, %p273_p8 }
  0x1a   :  { %281 = shalt.err (!%p278_p10)
}
  0x1b   :  { %s282_s16 = scalar_lea.vmem %s33_s8, 512  ;;  %p287_p12 = scmp.lt.s32.totalorder %s33_s8, %s33_s8 }
  0x1c   :  { %p283_p11 = scmp.ne.s32.totalorder %s33_s8, %s282_s16  ;;  %p288_p13 = scmp.lt.s32.totalorder %s282_s16, %s282_s16 }
  0x1e   :  { %p289_p0 = por %p288_p13, %p287_p12 }
  0x20   :  { %p290_p1 = pnand %p289_p0, %p283_p11 }
  0x22   :  { %293 = shalt.err (!%p290_p1)
}
  0x23   :  { %38 = dma.hbm_to_vmem [thread:$0]  %s438_s1, 512, %s33_s8, [#allocation8], %s347_s28, %s347_s28, %s348_s29  }
  0x24   :  { %338 = dma.done.wait [#allocation5], 256  }
  0x25   :  { %339 = vsyncadd [#allocation5], 4294967040 }
  0x26   :  { %340 = dma.done.wait [#allocation8], 512  }
  0x27   :  { %341 = vsyncadd [#allocation8], 4294966784  ;;  %vm61_vm0 = vcmask 261120   ;;  %v57_v0 = vld [vmem:[#allocation7] sm:$0xff]  ;;  %v58_v1 = vld [vmem:[#allocation7 + $0x8] sm:$0xff]  ;;  %v350_v8 = vmov 0.0  }
  0x28   :  { %v59_v2 = vld [vmem:[#allocation7 + $0x10] sm:$0xff]  ;;  %v233_v3 = vpack.c.bf16 %v58_v1, %v57_v0  ;;  %v60_v4 = vld [vmem:[#allocation7 + $0x18] sm:$0xff]  ;;  %53 = vst [vmem:[#allocation2] sm:$0x1] %v350_v8  ;;  %54 = vst [vmem:[#allocation3] sm:$0x1] %v350_v8 }
  0x29   :  { %v55_v5 = vld [vmem:[#allocation4] sm:$0xff]  ;;  %v237_v6 = vpack.c.bf16 %v60_v4, %v59_v2  ;;  %v56_v7 = vld [vmem:[#allocation4 + $0x8] sm:$0xff]  ;;  %v175_v39 = vld [vmem:[%s439_s2] sm:$0x1]  ;;  %s351_s19 = smov [#allocation9]   ;;  %s352_s23 = smov [#allocation10]  }
  0x2a   :  { %230 = vmatprep.mubr.msk.f32.mxu0 %vm61_vm0, %v55_v5  ;;  %234 = vmatprep.subr.bf16.mxu0 %v233_v3  ;;  %s190_s20 = sshll.u32 %s351_s19, 4  ;;  %v180_v42 = vld [vmem:[%s440_s3] sm:$0x1]  ;;  %s200_s24 = sshll.u32 %s352_s23, 4  ;;  %s191_s20 = int_to_ptr.vmem [resolvable:$true] %s190_s20  ;;  %s201_s24 = int_to_ptr.vmem [resolvable:$true] %s200_s24 }
  0x2b   :  { %236 = vmatpush3.bf16.msra.mxu0 %v233_v3  ;;  %s294_s25 = scalar_lea.vmem %s191_s20, 16  ;;  %s298_s26 = scalar_lea.vmem %s191_s20, 32 }
  0x2c   :  { %238 = vmatprep.subr.bf16.mxu0 %v237_v6  ;;  %p295_p2 = scmp.ne.s32.totalorder %s191_s20, %s294_s25  ;;  %p299_p3 = scmp.lt.s32.totalorder %s191_s20, %s191_s20 }
  0x2d   :  { %p300_p4 = scmp.lt.s32.totalorder %s298_s26, %s294_s25 }
  0x2f   :  { %240 = vmatpush3.bf16.msra.mxu0 %v237_v6  ;;  %v143_v24 = vld [vmem:[#allocation2] sm:$0x1]  ;;  %v153_v27 = vld [vmem:[#allocation3] sm:$0x1]  ;;  %p301_p5 = por %p300_p4, %p299_p3 }
  0x31   :  { %p302_p6 = pnand %p301_p5, %p295_p2 }
  0x32   :  { %231 = vmatmul.mubr.msk.f32.vlgmr.msra.gmra.mrb[0].mxu0 %vm61_vm0, %v56_v7 }
 0x105   :  { %v232_v9 = vpop.f32.mrb[0].mxu0 }
 0x106   :  { %v155_v10 = vmul.f32 %v232_v9, %v232_v9  ;;  %v134_v11 = vpop.f32.mrb[1].mxu0 }
 0x107   :  { %v144_v12 = vadd.f32 %v232_v9, %v134_v11  ;;  %v154_v13 = vmul.f32 %v134_v11, %v134_v11 }
 0x109   :  { %v145_v14 = vrot.slane %v144_v12, 4  ;;  %v156_v15 = vadd.f32 %v155_v10, %v154_v13 }
 0x10b   :  { %v146_v16 = vadd.f32 %v145_v14, %v144_v12  ;;  %v157_v17 = vrot.slane %v156_v15, 4 }
 0x10d   :  { %v147_v18 = vrot.slane %v146_v16, 2  ;;  %v158_v19 = vadd.f32 %v157_v17, %v156_v15 }
 0x10f   :  { %v148_v20 = vadd.f32 %v147_v18, %v146_v16  ;;  %v159_v21 = vrot.slane %v158_v19, 2 }
 0x111   :  { %v149_v22 = vrot.slane %v148_v20, 1  ;;  %v160_v23 = vadd.f32 %v159_v21, %v158_v19 }
 0x113   :  { %v150_v25 = vadd.f32 %v149_v22, %v148_v20  ;;  %v161_v26 = vrot.slane %v160_v23, 1 }
 0x115   :  { %v151_v28 = vadd.f32 %v150_v25, %v143_v24  ;;  %v162_v29 = vadd.f32 %v161_v26, %v160_v23 }
 0x117   :  { %152 = vst [vmem:[#allocation2] sm:$0x1] %v151_v28  ;;  %v163_v30 = vadd.f32 %v162_v29, %v153_v27 }
 0x119   :  { %164 = vst [vmem:[#allocation3] sm:$0x1] %v163_v30 }
 0x11e   :  { %v168_v31 = vld [vmem:[#allocation2] sm:$0x1] }
 0x11f   :  { %v169_v32 = vmul.f32 0.0625, %v168_v31 }
 0x120   :  { %v170_v33 = vld [vmem:[#allocation3] sm:$0x1] }
 0x121   :  { %v171_v34 = vmul.f32 0.0625, %v170_v33  ;;  %v172_v35 = vmul.f32 %v169_v32, %v169_v32 }
 0x123   :  { %v173_v36 = vsub.f32 %v171_v34, %v172_v35 }
 0x125   :  { %v174_v37 = vmax.f32 %v173_v36, 0.0 }
 0x127   :  { %v176_v38 = vadd.f32 1e-05, %v174_v37 }
 0x129   :  { %248 = vrsqrt.f32 %v176_v38 }
 0x133   :  { %v249_v40 = vpop.eup %248 }
 0x134   :  { %v178_v41 = vmul.f32 %v249_v40, %v175_v39 }
 0x136   :  { %179 = vst [vmem:[#allocation9] sm:$0x1] %v178_v41  ;;  %v181_v43 = vmul.f32 %v178_v41, %v169_v32 }
 0x137   :  { %305 = shalt.err (!%p302_p6)
}
 0x138   :  { %s306_s28 = scalar_lea.hbm %s441_s4, 16 }
 0x139   :  { %p307_p7 = scmp.ne.s32.totalorder %s441_s4, %s306_s28  ;;  %p310_p8 = scmp.lt.u32.totalorder %s306_s28, %s441_s4 }
 0x13b   :  { %p312_p9 = pnand %p310_p8, %p307_p7 }
 0x13d   :  { %315 = shalt.err (!%p312_p9)
}
 0x13e   :  { %193 = dma.vmem_to_hbm [thread:$0]  %s191_s20, 16, %s441_s4, [#allocation6]   ;;  %v182_v44 = vsub.f32 %v180_v42, %v181_v43 }
 0x13f   :  { %s316_s9 = scalar_lea.vmem %s201_s24, 16  ;;  %s320_s10 = scalar_lea.vmem %s201_s24, 32 }
 0x140   :  { %183 = vst [vmem:[#allocation10] sm:$0x1] %v182_v44  ;;  %p317_p10 = scmp.ne.s32.totalorder %s201_s24, %s316_s9  ;;  %p321_p11 = scmp.lt.s32.totalorder %s201_s24, %s201_s24 }
 0x141   :  { %p322_p12 = scmp.lt.s32.totalorder %s320_s10, %s316_s9 }
 0x143   :  { %p323_p13 = por %p322_p12, %p321_p11 }
 0x145   :  { %p324_p0 = pnand %p323_p13, %p317_p10 }
 0x147   :  { %327 = shalt.err (!%p324_p0)
}
 0x148   :  { %s328_s13 = scalar_lea.hbm %s442_s5, 16 }
 0x149   :  { %p329_p1 = scmp.ne.s32.totalorder %s442_s5, %s328_s13  ;;  %p332_p2 = scmp.lt.u32.totalorder %s328_s13, %s442_s5 }
 0x14b   :  { %p334_p3 = pnand %p332_p2, %p329_p1 }
 0x14d   :  { %337 = shalt.err (!%p334_p3)
}
 0x14e   :  { %203 = dma.vmem_to_hbm [thread:$0]  %s201_s24, 16, %s442_s5, [#allocation11]  }
 0x14f   :  { %342 = dma.done.wait [#allocation6], 16  }
 0x150   :  { %343 = vsyncadd [#allocation6], 4294967280 }
 0x151   :  { %344 = dma.done.wait [#allocation11], 16  }
 0x152   :  { %345 = vsyncadd [#allocation11], 4294967280 }
 0x153   :  { %210 = vsyncpa [#allocation5], 1 }
 0x154   :  { %211 = vsyncpa [#allocation8], 1 }
 0x155   :  { %212 = vsyncpa [#allocation6], 1 }
 0x156   :  { %213 = vsyncpa [#allocation11], 1 }

</bundles_post_ra>
